<compile_context>
chip_gen: v5e
topology: v5e:2x2
jax: 0.10.0
libtpu: 0.0.40
codegen_flags: <defaults>
</compile_context>

<pallas_src>
import math

import jax
import jax.numpy as jnp
from jax.experimental import pallas as pl
from jax.experimental.pallas import tpu as pltpu

N_BITS = 8
Q_MAX = float(2 ** N_BITS - 1)  # 255.0

_TARGET_BLOCK_BYTES = 2 * 1024 * 1024  # ~2 MiB of input data per block (HBM-roofline sized)
_MIN_GRID_STEPS = 8                     # keep enough steps for pipelining / megacore split


def quantizer_kernel(x_ref, o_ref, sz_ref):
    """x_ref: (TB, Dp) block in VMEM, native dtype. Per-row min/max -> fake-quant."""
    xn = x_ref[...]
    # Reduction on the native dtype (exact for f32/bf16); only (TB,1) results upcast.
    x_min = jnp.min(xn, axis=1, keepdims=True).astype(jnp.float32)
    x_max = jnp.max(xn, axis=1, keepdims=True).astype(jnp.float32)
    rng = jnp.maximum(x_max - x_min, 1e-8)
    scale = rng / Q_MAX                       # per-row, matches the torch formula
    inv_scale = Q_MAX / rng                   # per-row reciprocal for the hot path
    zero = jnp.round(-x_min / scale)
    # Hot path (per element): cast + 1 mul + round + clip + 1 mul; zero folded into bounds.
    xq = jnp.clip(jnp.round(xn.astype(jnp.float32) * inv_scale), -zero, Q_MAX - zero)
    o_ref[...] = (xq * scale).astype(o_ref.dtype)   # write back in the input dtype
    sz_ref[:, 0:1] = scale
    sz_ref[:, 1:2] = zero


def _choose_tb(B, D, itemsize):
    """Row tile: ~2 MiB input per block, >=8 grid steps, packed-sublane multiple."""
    sublane = max(32 // itemsize, 8)          # 8 (f32), 16 (bf16), 32 (int8/fp8)
    tb = max(_TARGET_BLOCK_BYTES // max(D * itemsize, 1), 1)
    tb = min(tb, max(pl.cdiv(B, _MIN_GRID_STEPS), 1))
    if tb >= B:
        return B                              # full extent: always a legal block shape
    if tb < sublane:
        # TODO(synk): for very large D a two-pass D-tiled layout with masked min/max
        # accumulation would keep the block within budget; fall back to the smallest
        # legal row tile and size the VMEM limit from it instead.
        return min(sublane, B)
    return (tb // sublane) * sublane


def _vmem_limit_bytes(tb, d_pad, itemsize):
    data = 2 * 2 * tb * d_pad * itemsize      # double-buffered input + output blocks
    temps = 2 * tb * d_pad * 4                # in-kernel f32 intermediates (estimate)
    needed = data + temps + (2 << 20)         # + headroom (scale/zero block, misc)
    try:
        cap = int(pltpu.get_tpu_info().vmem_capacity_bytes)
    except Exception:
        cap = 64 << 20                        # v7x physical VMEM (smallest generation)
    return int(min(max(needed, 16 << 20), (cap * 3) // 4))


def quantizer_forward(x):
    """Flattens NCHW -> (B, D), runs the tiled Pallas kernel, reshapes back.

    Returns (x_dequant, scale, zero); scale/zero are the per-channel (dim-0) values the
    torch module would store in its buffers on the first call.
    """
    B = x.shape[0]
    D = int(math.prod(x.shape[1:]))
    x2 = x.reshape(B, D)                      # no wrapper-side dtype cast

    # Lane-dense layout: pad D to a 128 multiple with each row's last element
    # (edge padding leaves per-row min/max unchanged); padded columns sliced off below.
    Dp = ((D + 127) // 128) * 128
    if Dp != D:
        x2 = jnp.pad(x2, ((0, 0), (0, Dp - D)), mode="edge")

    itemsize = jnp.dtype(x2.dtype).itemsize
    TB = _choose_tb(B, Dp, itemsize)
    grid = (pl.cdiv(B, TB),)

    out2, sz = pl.pallas_call(
        quantizer_kernel,
        out_shape=(
            jax.ShapeDtypeStruct((B, Dp), x2.dtype),
            jax.ShapeDtypeStruct((B, 2), jnp.float32),
        ),
        grid=grid,
        in_specs=[pl.BlockSpec((TB, Dp), lambda i: (i, 0))],
        out_specs=(
            pl.BlockSpec((TB, Dp), lambda i: (i, 0)),
            pl.BlockSpec((TB, 2), lambda i: (i, 0)),
        ),
        compiler_params=pltpu.CompilerParams(
            dimension_semantics=("parallel",),
            vmem_limit_bytes=_vmem_limit_bytes(TB, Dp, itemsize),
        ),
    )(x2)

    if Dp != D:
        out2 = out2[:, :D]
    return out2.reshape(x.shape), sz[:, 0], sz[:, 1]


def _reference_forward(x):
    """Pure-JAX reference mirroring the kernel math (min_max, channel_wise).

    Matches the torch module exactly except that the per-element divide is expressed as
    multiply-by-per-row-reciprocal and the zero-point is folded into the clip bounds
    (identical except at exact round-to-half ties).
    """
    B = x.shape[0]
    xf = x.reshape(B, -1).astype(jnp.float32)
    x_min = xf.min(axis=1, keepdims=True)
    x_max = xf.max(axis=1, keepdims=True)
    rng = jnp.maximum(x_max - x_min, 1e-8)
    scale = rng / Q_MAX
    inv_scale = Q_MAX / rng
    zero = jnp.round(-x_min / scale)
    xq = jnp.clip(jnp.round(xf * inv_scale), -zero, Q_MAX - zero)
    out = (xq * scale).astype(x.dtype).reshape(x.shape)
    return out, scale[:, 0], zero[:, 0]


if __name__ == "__main__":
    key = jax.random.PRNGKey(0)
    # Small NCHW activation-like input, matching the module's 4-D use case.
    x = jax.random.normal(key, (2, 4, 16, 16), dtype=jnp.float32) * 3.0 + 0.5

    x_dq, scale, zero = quantizer_forward(x)
    x_dq = jax.block_until_ready(x_dq)

    ref_out, ref_scale, ref_zero = _reference_forward(x)
    if not jnp.allclose(x_dq, ref_out, atol=1e-5, rtol=1e-5):
        raise AssertionError("Pallas quantizer output mismatch vs reference")
    if not jnp.allclose(scale, ref_scale, atol=1e-7, rtol=1e-6):
        raise AssertionError("Pallas quantizer scale mismatch vs reference")
    if not jnp.allclose(zero, ref_zero, atol=1e-5, rtol=1e-6):
        raise AssertionError("Pallas quantizer zero-point mismatch vs reference")

    print("KERNEL_OK")
</pallas_src>

<mosaic_0001>
module attributes {stable_mosaic.version = 11 : i64} {
  func.func @quantizer_kernel(%arg0: i32, %arg1: memref<2x1024xf32, #tpu.memory_space<vmem>>, %arg2: memref<2x1024xf32, #tpu.memory_space<vmem>>, %arg3: memref<2x2xf32, #tpu.memory_space<vmem>>) attributes {dimension_semantics = [#tpu.dimension_semantics<parallel>], iteration_bounds = array<i64: 1>, scalar_prefetch = 0 : i64, scratch_operands = 0 : i64, tpu.core_type = #tpu.core_type<tc>, window_params = [{transform_indices = @transform_0, window_bounds = array<i64: 2, 1024>}, {transform_indices = @transform_1, window_bounds = array<i64: 2, 1024>}, {transform_indices = @transform_2, window_bounds = array<i64: 2, 2>}]} {
    %c0 = arith.constant 0 : index
    %c0_0 = arith.constant 0 : index
    %0 = vector.load %arg1[%c0, %c0_0] : memref<2x1024xf32, #tpu.memory_space<vmem>>, vector<2x1024xf32>
    %cst = arith.constant dense<0x7F800000> : vector<2xf32>
    %1 = vector.multi_reduction <minimumf>, %0, %cst [1] : vector<2x1024xf32> to vector<2xf32>
    %2 = vector.shape_cast %1 : vector<2xf32> to vector<2x1xf32>
    %cst_1 = arith.constant dense<0xFF800000> : vector<2xf32>
    %3 = vector.multi_reduction <maximumf>, %0, %cst_1 [1] : vector<2x1024xf32> to vector<2xf32>
    %4 = vector.shape_cast %3 : vector<2xf32> to vector<2x1xf32>
    %5 = arith.subf %4, %2 : vector<2x1xf32>
    %cst_2 = arith.constant 9.99999993E-9 : f32
    %6 = vector.broadcast %cst_2 : f32 to vector<2x1xf32>
    %7 = arith.maximumf %5, %6 : vector<2x1xf32>
    %cst_3 = arith.constant 2.550000e+02 : f32
    %8 = vector.broadcast %cst_3 : f32 to vector<2x1xf32>
    %9 = arith.divf %7, %8 : vector<2x1xf32>
    %cst_4 = arith.constant 2.550000e+02 : f32
    %10 = vector.broadcast %cst_4 : f32 to vector<2x1xf32>
    %11 = arith.divf %10, %7 : vector<2x1xf32>
    %cst_5 = arith.constant 0.000000e+00 : f32
    %12 = vector.broadcast %cst_5 : f32 to vector<2x1xf32>
    %13 = arith.subf %12, %2 : vector<2x1xf32>
    %14 = arith.divf %13, %9 : vector<2x1xf32>
    %15 = math.roundeven %14 : vector<2x1xf32>
    %16 = vector.broadcast %11 : vector<2x1xf32> to vector<2x1024xf32>
    %17 = arith.mulf %0, %16 : vector<2x1024xf32>
    %18 = math.roundeven %17 : vector<2x1024xf32>
    %cst_6 = arith.constant 0.000000e+00 : f32
    %19 = vector.broadcast %cst_6 : f32 to vector<2x1xf32>
    %20 = arith.subf %19, %15 : vector<2x1xf32>
    %cst_7 = arith.constant 2.550000e+02 : f32
    %21 = vector.broadcast %cst_7 : f32 to vector<2x1xf32>
    %22 = arith.subf %21, %15 : vector<2x1xf32>
    %23 = vector.broadcast %20 : vector<2x1xf32> to vector<2x1024xf32>
    %24 = arith.maximumf %23, %18 : vector<2x1024xf32>
    %25 = vector.broadcast %22 : vector<2x1xf32> to vector<2x1024xf32>
    %26 = arith.minimumf %25, %24 : vector<2x1024xf32>
    %27 = vector.broadcast %9 : vector<2x1xf32> to vector<2x1024xf32>
    %28 = arith.mulf %26, %27 : vector<2x1024xf32>
    %c0_8 = arith.constant 0 : index
    %c0_9 = arith.constant 0 : index
    %29 = vector.load %arg2[%c0_8, %c0_9] : memref<2x1024xf32, #tpu.memory_space<vmem>>, vector<2x1024xf32>
    tpu.vector_store %arg2[%c0_8, %c0_9], %28 {strides = array<i32>} : memref<2x1024xf32, #tpu.memory_space<vmem>>, vector<2x1024xf32>,
    %c0_10 = arith.constant 0 : index
    %c0_11 = arith.constant 0 : index
    %30 = vector.load %arg3[%c0_10, %c0_11] : memref<2x2xf32, #tpu.memory_space<vmem>>, vector<2x1xf32>
    tpu.vector_store %arg3[%c0_10, %c0_11], %9 {strides = array<i32>} : memref<2x2xf32, #tpu.memory_space<vmem>>, vector<2x1xf32>,
    %c0_12 = arith.constant 0 : index
    %c1 = arith.constant 1 : index
    %31 = vector.load %arg3[%c0_12, %c1] : memref<2x2xf32, #tpu.memory_space<vmem>>, vector<2x1xf32>
    tpu.vector_store %arg3[%c0_12, %c1], %15 {strides = array<i32>} : memref<2x2xf32, #tpu.memory_space<vmem>>, vector<2x1xf32>,
    return
  }
  func.func @transform_0(%arg0: i32) -> (i32, i32) {
    %c0_i32 = arith.constant 0 : i32
    %c0_i32_0 = arith.constant 0 : i32
    return %arg0, %c0_i32 : i32, i32
  }
  func.func @transform_1(%arg0: i32) -> (i32, i32) {
    %c0_i32 = arith.constant 0 : i32
    %c0_i32_0 = arith.constant 0 : i32
    return %arg0, %c0_i32 : i32, i32
  }
  func.func @transform_2(%arg0: i32) -> (i32, i32) {
    %c0_i32 = arith.constant 0 : i32
    %c0_i32_0 = arith.constant 0 : i32
    return %arg0, %c0_i32 : i32, i32
  }
}

</mosaic_0001>

<bundles_post_ra>
// kernel: tpu_custom_call.1
= control target key start
LH: loop header
LB: loop body
LE: loop exit
PB: predicated region body
PF: predicated region fallthrough
CT: control target
= control target key end

     0   :  { %8 = vsyncpa [#allocation3], 0  ;;  %s455_s0 = inlined_call_operand.hbm [shape: f32[2,1024], index: 0, kind: input, shape index: {}]   ;;  %s456_s1 = inlined_call_operand.hbm [shape: f32[2,1024], index: 1, kind: output, shape index: {0}]   ;;  %s457_s2 = inlined_call_operand.hbm [shape: f32[2,2], index: 2, kind: output, shape index: {1}]  }
   0x1   :  { %9 = vsyncpa [#allocation4], 0 }
   0x2   :  { %10 = vsyncpa [#allocation7], 0  ;;  %s16_s11 = sshll.u32 %s455_s0, 4  ;;  %s378_s12 = smov [#allocation2]   ;;  %s17_s11 = int_to_ptr.hbm [resolvable:$true] %s16_s11 }
   0x3   :  { %s18_s13 = sshll.u32 %s378_s12, 4  ;;  %s19_s13 = int_to_ptr.vmem [resolvable:$true] %s18_s13 }
   0x4   :  { %21 = dma.hbm_to_vmem [thread:$0]  %s17_s11, 256, %s19_s13, [#allocation3]  }
   0x5   :  { %372 = dma.done.wait [#allocation3], 256  }
   0x6   :  { %373 = vsyncadd [#allocation3], 4294967040  ;;  %v401_v0 = vld [vmem:[#allocation2] sm:$0xff]  ;;  %v403_v1 = vld [vmem:[#allocation2 + $0x8] sm:$0xff]  ;;  %vm49_vm0 = vcmask 1041408   ;;  %v379_v48 = vmov 255.0  }
   0x7   :  { %30 = vst [vmem:[#allocation1] ss:$4 sm:$0xff] %v401_v0  ;;  %294 = vrcp.f32 %v379_v48  ;;  %vm228_vm2 = vcmask 1024   ;;  %s381_s0 = smov [#allocation6]   ;;  %s250_s17 = sshll.u32 %s457_s2, 4  ;;  %vm230_vm11 = vcmask 9224   ;;  %s251_s17 = int_to_ptr.hbm [resolvable:$true] %s250_s17 }
   0x8   :  { %32 = vst [vmem:[#allocation1 + $0x20] ss:$4 sm:$0xff] %v403_v1  ;;  %s248_s14 = sshll.u32 %s381_s0, 4  ;;  %vm217_vm15 = vcmask 1045508   ;;  %s382_s2 = smov [#allocation5]   ;;  %s249_s14 = int_to_ptr.vmem [resolvable:$true] %s248_s14 }
   0x9   :  { %s237_s18 = sshll.u32 %s382_s2, 4  ;;  %s239_s21 = sshll.u32 %s456_s1, 4  ;;  %s238_s18 = int_to_ptr.vmem [resolvable:$true] %s237_s18  ;;  %s240_s21 = int_to_ptr.hbm [resolvable:$true] %s239_s21 }
   0xd   :  { %v295_v49 = vpop.eup %294 }
   0xe   :  { %v33_v2 = vld.sshfl [vmem:[#allocation1] sm:$0xff pattern:$0x73625140]  ;;  %v34_v3 = vld.sshfl [vmem:[#allocation1 + $0x8] sm:$0xff pattern:$0x73625140]  ;;  %vm110_vm1 = vweird.f32 %v295_v49 }
   0xf   :  { %v35_v4 = vld.sshfl [vmem:[#allocation1 + $0x10] sm:$0xff pattern:$0x73625140]  ;;  %v36_v5 = vld.sshfl [vmem:[#allocation1 + $0x18] sm:$0xff pattern:$0x73625140] }
  0x10   :  { %v37_v6 = vld.sshfl [vmem:[#allocation1 + $0x20] sm:$0xff pattern:$0x73625140]  ;;  %v38_v7 = vld.sshfl [vmem:[#allocation1 + $0x28] sm:$0xff pattern:$0x73625140] }
  0x11   :  { %v39_v8 = vld.sshfl [vmem:[#allocation1 + $0x30] sm:$0xff pattern:$0x73625140]  ;;  %v40_v9 = vld.sshfl [vmem:[#allocation1 + $0x38] sm:$0xff pattern:$0x73625140] }
  0x12   :  { %v50_v10 = vsel %vm49_vm0, %v33_v2, inf  ;;  %v51_v11 = vsel %vm49_vm0, %v34_v3, inf  ;;  %v52_v12 = vsel %vm49_vm0, %v35_v4, inf  ;;  %v53_v13 = vsel %vm49_vm0, %v36_v5, inf  ;;  %67 = vst [vmem:[#allocation1] ss:$4 sm:$0xff] %v401_v0 }
  0x13   :  { %v54_v14 = vsel %vm49_vm0, %v37_v6, inf  ;;  %v56_v15 = vsel %vm49_vm0, %v38_v7, inf  ;;  %v58_v16 = vsel %vm49_vm0, %v39_v8, inf  ;;  %v60_v17 = vsel %vm49_vm0, %v40_v9, inf  ;;  %69 = vst [vmem:[#allocation1 + $0x20] ss:$4 sm:$0xff] %v403_v1 }
  0x14   :  { %v55_v18 = vmin.f32 %v50_v10, %v54_v14  ;;  %v57_v19 = vmin.f32 %v51_v11, %v56_v15  ;;  %v59_v20 = vmin.f32 %v52_v12, %v58_v16  ;;  %v61_v21 = vmin.f32 %v53_v13, %v60_v17 }
  0x15   :  { %v106_v50 = vmul.f32 255.0, %v295_v49  ;;  %v380_v3 = vmov 269488144  }
  0x16   :  { %v62_v22 = vmin.f32 %v55_v18, %v57_v19  ;;  %v63_v23 = vmin.f32 %v59_v20, %v61_v21  ;;  %v147_v4 = vunpack.c.l.s4 %v380_v3 }
  0x17   :  { %v107_v52 = vsub.f32 1.0, %v106_v50 }
  0x18   :  { %v64_v24 = vmin.f32 %v62_v22, %v63_v23  ;;  %v148_v13 = vunpack.c.0.s8 %v147_v4 }
  0x19   :  { %v70_v25 = vld.sshfl [vmem:[#allocation1] sm:$0xff pattern:$0x73625140]  ;;  %v71_v26 = vld.sshfl [vmem:[#allocation1 + $0x8] sm:$0xff pattern:$0x73625140]  ;;  %v108_v53 = vmul.f32 %v295_v49, %v107_v52 }
  0x1a   :  { %65 = vmin.xlane.f32.xlu0 %v64_v24  ;;  %v72_v27 = vld.sshfl [vmem:[#allocation1 + $0x10] sm:$0xff pattern:$0x73625140]  ;;  %v73_v28 = vld.sshfl [vmem:[#allocation1 + $0x18] sm:$0xff pattern:$0x73625140] }
  0x1b   :  { %v74_v29 = vld.sshfl [vmem:[#allocation1 + $0x20] sm:$0xff pattern:$0x73625140]  ;;  %v75_v30 = vld.sshfl [vmem:[#allocation1 + $0x28] sm:$0xff pattern:$0x73625140]  ;;  %v109_v54 = vadd.f32 %v295_v49, %v108_v53 }
  0x1c   :  { %v76_v31 = vld.sshfl [vmem:[#allocation1 + $0x30] sm:$0xff pattern:$0x73625140]  ;;  %v77_v32 = vld.sshfl [vmem:[#allocation1 + $0x38] sm:$0xff pattern:$0x73625140] }
  0x1d   :  { %v86_v33 = vsel %vm49_vm0, %v70_v25, -inf  ;;  %v87_v34 = vsel %vm49_vm0, %v71_v26, -inf  ;;  %v88_v35 = vsel %vm49_vm0, %v72_v27, -inf  ;;  %v89_v36 = vsel %vm49_vm0, %v73_v28, -inf }
  0x1e   :  { %v90_v37 = vsel %vm49_vm0, %v74_v29, -inf  ;;  %v92_v38 = vsel %vm49_vm0, %v75_v30, -inf  ;;  %v94_v39 = vsel %vm49_vm0, %v76_v31, -inf  ;;  %v96_v40 = vsel %vm49_vm0, %v77_v32, -inf }
  0x1f   :  { %v91_v41 = vmax.f32 %v86_v33, %v90_v37  ;;  %v93_v42 = vmax.f32 %v87_v34, %v92_v38  ;;  %v95_v43 = vmax.f32 %v88_v35, %v94_v39  ;;  %v97_v44 = vmax.f32 %v89_v36, %v96_v40 }
  0x20   :  { %v111_v57 = vsel %vm110_vm1, %v295_v49, %v109_v54  ;;  %vm219_vm1 = vcmask 1043456  }
  0x21   :  { %v98_v45 = vmax.f32 %v91_v41, %v93_v42  ;;  %v99_v46 = vmax.f32 %v95_v43, %v97_v44 }
  0x23   :  { %v100_v47 = vmax.f32 %v98_v45, %v99_v46 }
  0x25   :  { %101 = vmax.xlane.f32.xlu0 %v100_v47 }
  0x8d   :  { %v66_v51 = vpop.xlane.xlu0 %65 }
  0x8e   :  { %v128_v19 = vsub.f32 0.0, %v66_v51 }
  0x98   :  { %v102_v55 = vpop.xlane.xlu0 %101 }
  0x99   :  { %v103_v56 = vsub.f32 %v102_v55, %v66_v51 }
  0x9b   :  { %v104_v58 = vmax.f32 %v103_v56, 1e-08 }
  0x9d   :  { %v425_v59 = vmul.f32 %v111_v57, %v104_v58  ;;  %296 = vrcp.f32 %v104_v58  ;;  %v124_v5 = vand.u32 2147483648, %v104_v58  ;;  %v122_v7 = vand.u32 2147483647, %v104_v58 }
  0x9e   :  { %vm118_vm4 = vweird.f32 %v104_v58 }
  0x9f   :  { %298 = vrcp.f32 %v425_v59  ;;  %229 = vst.msk [vmem:[#allocation6] sm:$0x3] %vm228_vm2, %v425_v59  ;;  %v140_v9 = vand.u32 2147483648, %v425_v59  ;;  %v138_v12 = vand.u32 2147483647, %v425_v59  ;;  %v125_v14 = vor.u32 1.1754944e-38, %v124_v5 }
  0xa0   :  { %vm123_vm7 = vcmp.eq.f32.partialorder %v122_v7, 8.507059e+37  ;;  %vm134_vm8 = vweird.f32 %v425_v59 }
  0xa1   :  { %v141_v18 = vor.u32 1.1754944e-38, %v140_v9  ;;  %vm139_vm10 = vcmp.eq.f32.partialorder %v138_v12, 8.507059e+37 }
  0xa3   :  { %v297_v60 = vpop.eup %296 }
  0xa4   :  { %v114_v61 = vmul.f32 %v297_v60, %v104_v58  ;;  %vm119_vm3 = vweird.f32 %v297_v60 }
  0xa5   :  { %v299_v62 = vpop.eup %298  ;;  %vm120_vm6 = vmor %vm118_vm4, %vm119_vm3 }
  0xa6   :  { %v115_v63 = vsub.f32 1.0, %v114_v61  ;;  %v130_v2 = vmul.f32 %v299_v62, %v425_v59  ;;  %vm135_vm5 = vweird.f32 %v299_v62 }
  0xa7   :  { %vm136_vm9 = vmor %vm134_vm8, %vm135_vm5 }
  0xa8   :  { %v116_v6 = vmul.f32 %v297_v60, %v115_v63  ;;  %v131_v8 = vsub.f32 1.0, %v130_v2 }
  0xaa   :  { %v117_v10 = vadd.f32 %v297_v60, %v116_v6  ;;  %v132_v11 = vmul.f32 %v299_v62, %v131_v8 }
  0xac   :  { %v121_v15 = vsel %vm120_vm6, %v297_v60, %v117_v10  ;;  %v133_v16 = vadd.f32 %v299_v62, %v132_v11 }
  0xad   :  { %v126_v17 = vsel %vm123_vm7, %v125_v14, %v121_v15 }
  0xae   :  { %v127_v20 = vmul.f32 255.0, %v126_v17  ;;  %v137_v21 = vsel %vm136_vm9, %v299_v62, %v133_v16 }
  0xaf   :  { %v142_v22 = vsel %vm139_vm10, %v141_v18, %v137_v21 }
  0xb0   :  { %v149_v23 = vperm.slane %v127_v20, %v148_v13  ;;  %v143_v24 = vmul.f32 %v142_v22, %v128_v19 }
  0xb2   :  { %v151_v25 = vmul.f32 %v149_v23, %v401_v0  ;;  %v152_v26 = vmul.f32 %v149_v23, %v403_v1  ;;  %v267_v27 = vcvt.f32.s32 %v143_v24  ;;  %v265_v32 = vand.u32 2147483647, %v143_v24 }
  0xb3   :  { %v270_v36 = vand.u32 2147483648, %v143_v24 }
  0xb4   :  { %v275_v28 = vcvt.f32.s32 %v151_v25  ;;  %v283_v29 = vcvt.f32.s32 %v152_v26  ;;  %v268_v30 = vcvt.s32.f32 %v267_v27  ;;  %v273_v33 = vand.u32 2147483647, %v151_v25 }
  0xb5   :  { %v278_v0 = vand.u32 2147483648, %v151_v25  ;;  %v281_v38 = vand.u32 2147483647, %v152_v26  ;;  %v286_v39 = vand.u32 2147483648, %v152_v26  ;;  %vm266_vm12 = vcmp.lt.f32.partialorder %v265_v32, 8388608.0 }
  0xb6   :  { %v276_v31 = vcvt.s32.f32 %v275_v28  ;;  %v284_v34 = vcvt.s32.f32 %v283_v29  ;;  %v269_v35 = vand.u32 2147483647, %v268_v30  ;;  %vm274_vm13 = vcmp.lt.f32.partialorder %v273_v33, 8388608.0 }
  0xb7   :  { %vm282_vm14 = vcmp.lt.f32.partialorder %v281_v38, 8388608.0 }
  0xb8   :  { %v277_v37 = vand.u32 2147483647, %v276_v31  ;;  %v285_v1 = vand.u32 2147483647, %v284_v34  ;;  %v271_v40 = vor.u32 %v270_v36, %v269_v35 }
  0xba   :  { %v279_v41 = vor.u32 %v278_v0, %v277_v37  ;;  %v287_v42 = vor.u32 %v286_v39, %v285_v1  ;;  %v272_v43 = vsel %vm266_vm12, %v271_v40, %v143_v24 }
  0xbb   :  { %231 = vst.msk [vmem:[#allocation6] sm:$0x3] %vm230_vm11, %v272_v43  ;;  %v155_v46 = vsub.f32 0.0, %v272_v43  ;;  %v156_v47 = vsub.f32 255.0, %v272_v43 }
  0xbc   :  { %v280_v44 = vsel %vm274_vm13, %v279_v41, %v151_v25  ;;  %v288_v45 = vsel %vm282_vm14, %v287_v42, %v152_v26  ;;  %253 = dma.vmem_to_hbm [thread:$0]  %s249_s14, 32, %s251_s17, [#allocation7]  }
  0xbd   :  { %159 = vst [vmem:[#allocation1] ss:$4 sm:$0xff] %v280_v44 }
  0xbe   :  { %161 = vst [vmem:[#allocation1 + $0x20] ss:$4 sm:$0xff] %v288_v45 }
  0xc4   :  { %v162_v48 = vld.sshfl [vmem:[#allocation1] sm:$0xff pattern:$0x73625140]  ;;  %v163_v49 = vld.sshfl [vmem:[#allocation1 + $0x8] sm:$0xff pattern:$0x73625140] }
  0xc5   :  { %v164_v50 = vld.sshfl [vmem:[#allocation1 + $0x10] sm:$0xff pattern:$0x73625140]  ;;  %v165_v51 = vld.sshfl [vmem:[#allocation1 + $0x18] sm:$0xff pattern:$0x73625140]  ;;  %v178_v52 = vmax.f32 %v155_v46, %v162_v48  ;;  %v179_v53 = vmax.f32 %v155_v46, %v163_v49 }
  0xc6   :  { %v166_v54 = vld.sshfl [vmem:[#allocation1 + $0x20] sm:$0xff pattern:$0x73625140]  ;;  %v167_v55 = vld.sshfl [vmem:[#allocation1 + $0x28] sm:$0xff pattern:$0x73625140]  ;;  %v180_v56 = vmax.f32 %v155_v46, %v164_v50  ;;  %v181_v57 = vmax.f32 %v155_v46, %v165_v51 }
  0xc7   :  { %v168_v58 = vld.sshfl [vmem:[#allocation1 + $0x30] sm:$0xff pattern:$0x73625140]  ;;  %v169_v60 = vld.sshfl [vmem:[#allocation1 + $0x38] sm:$0xff pattern:$0x73625140]  ;;  %v182_v61 = vmax.f32 %v155_v46, %v166_v54  ;;  %v183_v62 = vmax.f32 %v155_v46, %v167_v55  ;;  %v186_v63 = vmin.f32 %v156_v47, %v178_v52  ;;  %v187_v2 = vmin.f32 %v156_v47, %v179_v53 }
  0xc8   :  { %v184_v3 = vmax.f32 %v155_v46, %v168_v58  ;;  %v185_v4 = vmax.f32 %v155_v46, %v169_v60  ;;  %v188_v5 = vmin.f32 %v156_v47, %v180_v56  ;;  %v189_v6 = vmin.f32 %v156_v47, %v181_v57 }
  0xc9   :  { %v190_v7 = vmin.f32 %v156_v47, %v182_v61  ;;  %v191_v8 = vmin.f32 %v156_v47, %v183_v62  ;;  %v195_v9 = vmul.f32 %v187_v2, %v425_v59  ;;  %v194_v14 = vmul.f32 %v186_v63, %v425_v59 }
  0xca   :  { %v192_v10 = vmin.f32 %v156_v47, %v184_v3  ;;  %v193_v11 = vmin.f32 %v156_v47, %v185_v4  ;;  %v196_v12 = vmul.f32 %v188_v5, %v425_v59  ;;  %v197_v13 = vmul.f32 %v189_v6, %v425_v59 }
  0xcb   :  { %v199_v15 = vmul.f32 %v191_v8, %v425_v59  ;;  %v210_v16 = vrot.slane %v195_v9, 6  ;;  %v198_v21 = vmul.f32 %v190_v7, %v425_v59 }
  0xcc   :  { %v200_v17 = vmul.f32 %v192_v10, %v425_v59  ;;  %v201_v18 = vmul.f32 %v193_v11, %v425_v59  ;;  %v211_v19 = vrot.slane %v196_v12, 4  ;;  %v212_v20 = vrot.slane %v197_v13, 2 }
  0xcd   :  { %v213_v22 = vrot.slane %v199_v15, 6  ;;  %v216_v23 = vsel %vm49_vm0, %v194_v14, %v210_v16 }
  0xce   :  { %v214_v24 = vrot.slane %v200_v17, 4  ;;  %v215_v25 = vrot.slane %v201_v18, 2  ;;  %v218_v26 = vsel %vm217_vm15, %v211_v19, %v212_v20 }
  0xcf   :  { %v220_v27 = vsel %vm219_vm1, %v216_v23, %v218_v26  ;;  %v221_v28 = vsel %vm49_vm0, %v198_v21, %v213_v22 }
  0xd0   :  { %v222_v29 = vsel %vm217_vm15, %v214_v24, %v215_v25  ;;  %226 = vst [vmem:[#allocation5] sm:$0xff] %v220_v27 }
  0xd1   :  { %v223_v59 = vsel %vm219_vm1, %v221_v28, %v222_v29 }
  0xd2   :  { %227 = vst [vmem:[#allocation5 + $0x8] sm:$0xff] %v223_v59 }
  0xd3   :  { %242 = dma.vmem_to_hbm [thread:$0]  %s238_s18, 256, %s240_s21, [#allocation4]  }
  0xd4   :  { %374 = dma.done.wait [#allocation4], 256  }
  0xd5   :  { %375 = vsyncadd [#allocation4], 4294967040 }
  0xd6   :  { %376 = dma.done.wait [#allocation7], 32  }
  0xd7   :  { %377 = vsyncadd [#allocation7], 4294967264 }
  0xd8   :  { %262 = vsyncpa [#allocation3], 1 }
  0xd9   :  { %263 = vsyncpa [#allocation4], 1 }
  0xda   :  { %264 = vsyncpa [#allocation7], 1 }

</bundles_post_ra>
